<compile_context>
chip_gen: v5e
topology: v5e:2x2
jax: 0.10.0
libtpu: 0.0.40
codegen_flags: <defaults>
</compile_context>

<pallas_src>
import functools

import jax
import jax.numpy as jnp
from jax.experimental import pallas as pl
from jax.experimental.pallas import tpu as pltpu

_BN_EPS = 1e-5


def _bn_stats(v_lo, v2_lo, m):
    """Batch mean / biased variance on the (N, B*C) lane layout.

    m = kron(ones((B,B))/B, I_C) averages over batch groups along the lane
    axis, so `v @ m` is the per-(node, channel) batch mean already broadcast
    back to every batch element.  mean and E[x^2] are two *independent* MXU
    dots (no VPU round trip between them), then var = E[x^2] - mean^2.
    """
    mu = jnp.dot(v_lo, m, preferred_element_type=jnp.float32)
    ex2 = jnp.dot(v2_lo, m, preferred_element_type=jnp.float32)
    var = jnp.maximum(ex2 - mu * mu, 0.0)   # guard tiny negatives from cancellation
    return mu, var


def _gcn_fused_kernel(*refs, n_layers):
    """Entire GCN forward: bn_in + n_layers * (graph conv + fc + bn + relu)."""
    l_ref, x_ref, m_in_ref, m_hid_ref = refs[:4]
    w_refs = refs[4:4 + n_layers]        # kron(I_B, W_i^T): (B*S_i, B*H), bf16
    o_ref = refs[4 + n_layers]

    bf16 = jnp.bfloat16
    L_bf = l_ref[...].astype(bf16)       # (N, N): cast once, reused by every layer
    m_hid = m_hid_ref[...]               # (B*H, B*H) bf16
    m_in = m_in_ref[...]                 # (B*F, B*F) f32

    # Input BN: f32 dot operands (raw x can have |mean| >> std per channel,
    # so keep full precision in the E[x^2]-mean^2 statistics here).
    v = x_ref[...]                                                       # (N, B*F) f32
    mu, var = _bn_stats(v, v * v, m_in)
    h = (v - mu) * jax.lax.rsqrt(var + _BN_EPS)

    for w_ref in w_refs:                                                 # static unroll
        lh = jnp.dot(L_bf, h.astype(bf16), preferred_element_type=jnp.float32)
        z = jnp.dot(lh.astype(bf16), w_ref[...], preferred_element_type=jnp.float32)
        # Hidden BN: batch-mean of z is ~0, so bf16 + E[x^2]-mean^2 is safe.
        mu, var = _bn_stats(z.astype(bf16), (z * z).astype(bf16), m_hid)
        h = jnp.maximum((z - mu) * jax.lax.rsqrt(var + _BN_EPS), 0.0)    # bn + relu

    o_ref[...] = h                       # (N, B*H) = (8, 128): lane-dense store


def make_gcn_forward(L, fc_weights, batch):
    """Build the GCN forward once per model (nn.Module __init__ analogue).

    All derived operators (block-diagonal kron'd weights, BN batch-averaging
    matrices, dtype casts) are computed HERE, once, and closed over by a
    jax.jit'ed forward, so the per-call path is a single pallas_call.
    """
    n = L.shape[0]
    hidden, f = fc_weights[0].shape
    n_layers = len(fc_weights)
    f32, bf16 = jnp.float32, jnp.bfloat16

    eye_b = jnp.eye(batch, dtype=f32)
    avg_b = jnp.full((batch, batch), 1.0 / batch, dtype=f32)
    m_in = jnp.kron(avg_b, jnp.eye(f, dtype=f32))                      # (B*F, B*F) f32
    m_hid = jnp.kron(avg_b, jnp.eye(hidden, dtype=f32)).astype(bf16)   # (B*H, B*H)
    # Block-diagonal weights: z[n, b*H+h] = sum_s lh[n, b*S+s] * W[h, s].
    # TODO(synk): kron(I_B, W^T) is a toy-size-only trick (B^2 x weight VMEM,
    # B x zero MXU columns).  If B or H grows, move batch onto the sublane
    # axis instead ((N*B, S) @ W^T with graph conv as kron(L, I_B)) to keep
    # the original W footprint; below one MXU tile here, so it costs nothing.
    w_blk = tuple(jnp.kron(eye_b, w.astype(f32).T).astype(bf16) for w in fc_weights)
    # L stays f32 on the wire (an (8,8) bf16 operand buys nothing); it is cast
    # to bf16 once inside the kernel for the MXU dots.
    L_f32 = L.astype(f32)

    # TODO(synk): at real graph sizes, tile L/h over a node-block grid axis
    # (dimension_semantics=("parallel", ...), explicit vmem_limit_bytes, K
    # tiles a multiple of 128/256) and stream per-layer weights via a layer
    # grid axis instead of full-array VMEM residency; required for v7x's
    # 64 MiB VMEM and to use its second TensorCore.  Unnecessary at N=8.
    vmem = pl.BlockSpec(memory_space=pltpu.MemorySpace.VMEM)
    call = pl.pallas_call(
        functools.partial(_gcn_fused_kernel, n_layers=n_layers),
        out_shape=jax.ShapeDtypeStruct((n, batch * hidden), f32),
        in_specs=[vmem] * (4 + n_layers),
        out_specs=vmem,
    )

    @jax.jit
    def forward(x):
        x2 = x.astype(f32).reshape(n, batch * f)        # lane order (batch, feat)
        out2 = call(L_f32, x2, m_in, m_hid, *w_blk)
        return out2.reshape(n, batch, hidden)

    return forward


def gcn_reference(x, L, fc_weights):
    """Pure-JAX reference mirroring the PyTorch forward (training-mode BN)."""
    def bn(t):
        mean = t.mean(axis=1, keepdims=True)
        var = ((t - mean) ** 2).mean(axis=1, keepdims=True)
        return (t - mean) / jnp.sqrt(var + _BN_EPS)

    h = bn(x.astype(jnp.float32))
    for w in fc_weights:
        lh = jnp.einsum("nm,mbs->nbs", L, h)
        z = jnp.einsum("nbs,hs->nbh", lh, w)
        h = jax.nn.relu(bn(z))
    return h


def ring_laplacian(n):
    """Deterministic normalized Laplacian of a ring graph with n nodes."""
    a = jnp.zeros((n, n), jnp.float32)
    idx = jnp.arange(n)
    a = a.at[idx, (idx + 1) % n].set(1.0)
    a = a.at[idx, (idx - 1) % n].set(1.0)
    d_inv_sqrt = 1.0 / jnp.sqrt(a.sum(axis=1))
    return jnp.eye(n, dtype=jnp.float32) - d_inv_sqrt[:, None] * a * d_inv_sqrt[None, :]


if __name__ == "__main__":
    nodes_n, batch, features_n, hidden, layers_n = 8, 4, 16, 32, 3
    hidden_layers_n = layers_n - 1

    key = jax.random.PRNGKey(0)
    kx, *kws = jax.random.split(key, 1 + hidden_layers_n)

    x = jax.random.normal(kx, (nodes_n, batch, features_n), jnp.float32)
    L = ring_laplacian(nodes_n)

    # nn.Linear weights, init.uniform_ -> U[0, 1); shapes (out_features, in_features)
    fc_weights = []
    for i in range(hidden_layers_n):
        in_f = features_n if i == 0 else hidden
        fc_weights.append(jax.random.uniform(kws[i], (hidden, in_f), jnp.float32))

    gcn_forward = make_gcn_forward(L, fc_weights, batch)   # per-model setup, once
    out = jax.block_until_ready(gcn_forward(x))
    ref = gcn_reference(x, L, fc_weights)

    assert out.shape == (nodes_n, batch, hidden), out.shape
    assert bool(jnp.all(jnp.isfinite(out)))
    assert bool(jnp.allclose(out, ref, rtol=5e-2, atol=5e-2)), float(
        jnp.max(jnp.abs(out - ref))
    )
    print("KERNEL_OK")
</pallas_src>

<mosaic_0001>
module attributes {stable_mosaic.version = 11 : i64} {
  func.func @_gcn_fused_kernel(%arg0: memref<8x8xf32, #tpu.memory_space<vmem>>, %arg1: memref<8x64xf32, #tpu.memory_space<vmem>>, %arg2: memref<64x64xf32, #tpu.memory_space<vmem>>, %arg3: memref<128x128xbf16, #tpu.memory_space<vmem>>, %arg4: memref<64x128xbf16, #tpu.memory_space<vmem>>, %arg5: memref<128x128xbf16, #tpu.memory_space<vmem>>, %arg6: memref<8x128xf32, #tpu.memory_space<vmem>>) attributes {dimension_semantics = [], scalar_prefetch = 0 : i64, scratch_operands = 0 : i64, tpu.core_type = #tpu.core_type<tc>} {
    %c0 = arith.constant 0 : index
    %c0_0 = arith.constant 0 : index
    %0 = vector.load %arg0[%c0, %c0_0] : memref<8x8xf32, #tpu.memory_space<vmem>>, vector<8x8xf32>
    %1 = arith.truncf %0 : vector<8x8xf32> to vector<8x8xbf16>
    %c0_1 = arith.constant 0 : index
    %c0_2 = arith.constant 0 : index
    %2 = vector.load %arg3[%c0_1, %c0_2] : memref<128x128xbf16, #tpu.memory_space<vmem>>, vector<128x128xbf16>
    %c0_3 = arith.constant 0 : index
    %c0_4 = arith.constant 0 : index
    %3 = vector.load %arg2[%c0_3, %c0_4] : memref<64x64xf32, #tpu.memory_space<vmem>>, vector<64x64xf32>
    %c0_5 = arith.constant 0 : index
    %c0_6 = arith.constant 0 : index
    %4 = vector.load %arg1[%c0_5, %c0_6] : memref<8x64xf32, #tpu.memory_space<vmem>>, vector<8x64xf32>
    %5 = arith.mulf %4, %4 : vector<8x64xf32>
    %cst = arith.constant dense<0.000000e+00> : vector<8x64xf32>
    %6 = tpu.matmul %4, %3, %cst {dimension_numbers = #tpu.dot_dimension_numbers<[1], [0], [0], [1], [0, 0, 1, 1], [], []>} : vector<8x64xf32>, vector<64x64xf32>, vector<8x64xf32> -> vector<8x64xf32>
    %cst_7 = arith.constant dense<0.000000e+00> : vector<8x64xf32>
    %7 = tpu.matmul %5, %3, %cst_7 {dimension_numbers = #tpu.dot_dimension_numbers<[1], [0], [0], [1], [0, 0, 1, 1], [], []>} : vector<8x64xf32>, vector<64x64xf32>, vector<8x64xf32> -> vector<8x64xf32>
    %8 = arith.mulf %6, %6 : vector<8x64xf32>
    %9 = arith.subf %7, %8 : vector<8x64xf32>
    %cst_8 = arith.constant 0.000000e+00 : f32
    %10 = vector.broadcast %cst_8 : f32 to vector<8x64xf32>
    %11 = arith.maximumf %9, %10 : vector<8x64xf32>
    %12 = arith.subf %4, %6 : vector<8x64xf32>
    %cst_9 = arith.constant 9.99999974E-6 : f32
    %13 = vector.broadcast %cst_9 : f32 to vector<8x64xf32>
    %14 = arith.addf %11, %13 : vector<8x64xf32>
    %15 = math.rsqrt %14 : vector<8x64xf32>
    %16 = arith.mulf %12, %15 : vector<8x64xf32>
    %17 = arith.truncf %16 : vector<8x64xf32> to vector<8x64xbf16>
    %cst_10 = arith.constant dense<0.000000e+00> : vector<8x64xf32>
    %18 = tpu.matmul %1, %17, %cst_10 {dimension_numbers = #tpu.dot_dimension_numbers<[1], [0], [0], [1], [0, 0, 1, 1], [], []>} : vector<8x8xbf16>, vector<8x64xbf16>, vector<8x64xf32> -> vector<8x64xf32>
    %19 = arith.truncf %18 : vector<8x64xf32> to vector<8x64xbf16>
    %c0_11 = arith.constant 0 : index
    %c0_12 = arith.constant 0 : index
    %20 = vector.load %arg4[%c0_11, %c0_12] : memref<64x128xbf16, #tpu.memory_space<vmem>>, vector<64x128xbf16>
    %cst_13 = arith.constant dense<0.000000e+00> : vector<8x128xf32>
    %21 = tpu.matmul %19, %20, %cst_13 {dimension_numbers = #tpu.dot_dimension_numbers<[1], [0], [0], [1], [0, 0, 1, 1], [], []>} : vector<8x64xbf16>, vector<64x128xbf16>, vector<8x128xf32> -> vector<8x128xf32>
    %22 = arith.truncf %21 : vector<8x128xf32> to vector<8x128xbf16>
    %23 = arith.mulf %21, %21 : vector<8x128xf32>
    %24 = arith.truncf %23 : vector<8x128xf32> to vector<8x128xbf16>
    %cst_14 = arith.constant dense<0.000000e+00> : vector<8x128xf32>
    %25 = tpu.matmul %22, %2, %cst_14 {dimension_numbers = #tpu.dot_dimension_numbers<[1], [0], [0], [1], [0, 0, 1, 1], [], []>} : vector<8x128xbf16>, vector<128x128xbf16>, vector<8x128xf32> -> vector<8x128xf32>
    %cst_15 = arith.constant dense<0.000000e+00> : vector<8x128xf32>
    %26 = tpu.matmul %24, %2, %cst_15 {dimension_numbers = #tpu.dot_dimension_numbers<[1], [0], [0], [1], [0, 0, 1, 1], [], []>} : vector<8x128xbf16>, vector<128x128xbf16>, vector<8x128xf32> -> vector<8x128xf32>
    %27 = arith.mulf %25, %25 : vector<8x128xf32>
    %28 = arith.subf %26, %27 : vector<8x128xf32>
    %cst_16 = arith.constant 0.000000e+00 : f32
    %29 = vector.broadcast %cst_16 : f32 to vector<8x128xf32>
    %30 = arith.maximumf %28, %29 : vector<8x128xf32>
    %31 = arith.subf %21, %25 : vector<8x128xf32>
    %cst_17 = arith.constant 9.99999974E-6 : f32
    %32 = vector.broadcast %cst_17 : f32 to vector<8x128xf32>
    %33 = arith.addf %30, %32 : vector<8x128xf32>
    %34 = math.rsqrt %33 : vector<8x128xf32>
    %35 = arith.mulf %31, %34 : vector<8x128xf32>
    %cst_18 = arith.constant 0.000000e+00 : f32
    %36 = vector.broadcast %cst_18 : f32 to vector<8x128xf32>
    %37 = arith.maximumf %35, %36 : vector<8x128xf32>
    %38 = arith.truncf %37 : vector<8x128xf32> to vector<8x128xbf16>
    %cst_19 = arith.constant dense<0.000000e+00> : vector<8x128xf32>
    %39 = tpu.matmul %1, %38, %cst_19 {dimension_numbers = #tpu.dot_dimension_numbers<[1], [0], [0], [1], [0, 0, 1, 1], [], []>} : vector<8x8xbf16>, vector<8x128xbf16>, vector<8x128xf32> -> vector<8x128xf32>
    %40 = arith.truncf %39 : vector<8x128xf32> to vector<8x128xbf16>
    %c0_20 = arith.constant 0 : index
    %c0_21 = arith.constant 0 : index
    %41 = vector.load %arg5[%c0_20, %c0_21] : memref<128x128xbf16, #tpu.memory_space<vmem>>, vector<128x128xbf16>
    %cst_22 = arith.constant dense<0.000000e+00> : vector<8x128xf32>
    %42 = tpu.matmul %40, %41, %cst_22 {dimension_numbers = #tpu.dot_dimension_numbers<[1], [0], [0], [1], [0, 0, 1, 1], [], []>} : vector<8x128xbf16>, vector<128x128xbf16>, vector<8x128xf32> -> vector<8x128xf32>
    %43 = arith.truncf %42 : vector<8x128xf32> to vector<8x128xbf16>
    %44 = arith.mulf %42, %42 : vector<8x128xf32>
    %45 = arith.truncf %44 : vector<8x128xf32> to vector<8x128xbf16>
    %cst_23 = arith.constant dense<0.000000e+00> : vector<8x128xf32>
    %46 = tpu.matmul %43, %2, %cst_23 {dimension_numbers = #tpu.dot_dimension_numbers<[1], [0], [0], [1], [0, 0, 1, 1], [], []>} : vector<8x128xbf16>, vector<128x128xbf16>, vector<8x128xf32> -> vector<8x128xf32>
    %cst_24 = arith.constant dense<0.000000e+00> : vector<8x128xf32>
    %47 = tpu.matmul %45, %2, %cst_24 {dimension_numbers = #tpu.dot_dimension_numbers<[1], [0], [0], [1], [0, 0, 1, 1], [], []>} : vector<8x128xbf16>, vector<128x128xbf16>, vector<8x128xf32> -> vector<8x128xf32>
    %48 = arith.mulf %46, %46 : vector<8x128xf32>
    %49 = arith.subf %47, %48 : vector<8x128xf32>
    %cst_25 = arith.constant 0.000000e+00 : f32
    %50 = vector.broadcast %cst_25 : f32 to vector<8x128xf32>
    %51 = arith.maximumf %49, %50 : vector<8x128xf32>
    %52 = arith.subf %42, %46 : vector<8x128xf32>
    %cst_26 = arith.constant 9.99999974E-6 : f32
    %53 = vector.broadcast %cst_26 : f32 to vector<8x128xf32>
    %54 = arith.addf %51, %53 : vector<8x128xf32>
    %55 = math.rsqrt %54 : vector<8x128xf32>
    %56 = arith.mulf %52, %55 : vector<8x128xf32>
    %cst_27 = arith.constant 0.000000e+00 : f32
    %57 = vector.broadcast %cst_27 : f32 to vector<8x128xf32>
    %58 = arith.maximumf %56, %57 : vector<8x128xf32>
    %c0_28 = arith.constant 0 : index
    %c0_29 = arith.constant 0 : index
    %59 = vector.load %arg6[%c0_28, %c0_29] : memref<8x128xf32, #tpu.memory_space<vmem>>, vector<8x128xf32>
    tpu.vector_store %arg6[%c0_28, %c0_29], %58 {strides = array<i32>} : memref<8x128xf32, #tpu.memory_space<vmem>>, vector<8x128xf32>,
    return
  }
}

</mosaic_0001>

<bundles_post_ra>
// kernel: forward.1
= control target key start
LH: loop header
LB: loop body
LE: loop exit
PB: predicated region body
PF: predicated region fallthrough
CT: control target
= control target key end

     0   :  { %11 = vsyncpa [#allocation3], 0  ;;  %s800_s0 = inlined_call_operand.vmem [shape: f32[8,8], index: 0, kind: input, shape index: {}]   ;;  %s801_s1 = inlined_call_operand.vmem [shape: f32[8,64], index: 1, kind: input, shape index: {}]   ;;  %s802_s2 = inlined_call_operand.hbm [shape: f32[64,64], index: 2, kind: input, shape index: {}]   ;;  %s803_s3 = inlined_call_operand.hbm [shape: bf16[128,128], index: 3, kind: input, shape index: {}]   ;;  %s804_s4 = inlined_call_operand.vmem [shape: bf16[64,128], index: 4, kind: input, shape index: {}]   ;;  %s805_s5 = inlined_call_operand.hbm [shape: bf16[128,128], index: 5, kind: input, shape index: {}]   ;;  %s806_s6 = inlined_call_operand.vmem [shape: f32[8,128], index: 6, kind: output, shape index: {}]  }
   0x1   :  { %12 = vsyncpa [#allocation5], 0  ;;  %s34_s23 = sshll.u32 %s803_s3, 4  ;;  %s669_s24 = smov [#allocation4]   ;;  %s35_s23 = int_to_ptr.hbm [resolvable:$true] %s34_s23 }
   0x2   :  { %s36_s25 = sshll.u32 %s669_s24, 4  ;;  %s21_s28 = sshll.u32 %s802_s2, 4  ;;  %s37_s25 = int_to_ptr.vmem [resolvable:$true] %s36_s25  ;;  %s22_s28 = int_to_ptr.hbm [resolvable:$true] %s21_s28 }
   0x3   :  { %s670_s29 = smov 64   ;;  %s671_s30 = smov 4  }
   0x4   :  { %42 = dma.hbm_to_vmem [thread:$0]  %s35_s23, 1024, %s37_s25, [#allocation5], %s670_s29, %s670_s29, %s671_s30  }
   0x5   :  { %s672_s7 = smov [#allocation2]   ;;  %s673_s9 = smov 128  }
   0x6   :  { %s23_s8 = sshll.u32 %s672_s7, 4  ;;  %s674_s10 = smov 8   ;;  %s24_s8 = int_to_ptr.vmem [resolvable:$true] %s23_s8 }
   0x7   :  { %29 = dma.hbm_to_vmem [thread:$0]  %s22_s28, 1024, %s24_s8, [#allocation3], %s673_s9, %s673_s9, %s674_s10  }
   0x8   :  { %s49_s12 = sshll.u32 %s805_s5, 4  ;;  %s675_s13 = smov [#allocation6]   ;;  %s50_s12 = int_to_ptr.hbm [resolvable:$true] %s49_s12 }
   0x9   :  { %s51_s14 = sshll.u32 %s675_s13, 4  ;;  %s52_s14 = int_to_ptr.vmem [resolvable:$true] %s51_s14 }
   0xa   :  { %57 = dma.hbm_to_vmem [thread:$0]  %s50_s12, 1024, %s52_s14, [#allocation5], %s670_s29, %s670_s29, %s671_s30  }
   0xb   :  { %665 = dma.done.wait [#allocation3], 1024  }
   0xc   :  { %666 = vsyncadd [#allocation3], 4294966272 }
   0xd   :  { %667 = dma.done.wait [#allocation5], 2048  }
   0xe   :  { %668 = vsyncadd [#allocation5], 4294965248  ;;  %v96_v0 = vld [vmem:[#allocation2 + $0x38] sm:$0xff]  ;;  %v95_v1 = vld [vmem:[#allocation2 + $0x30] sm:$0xff]  ;;  %vm99_vm0 = vcmask 523264   ;;  %vm167_vm4 = vcmask 1043456  }
   0xf   :  { %111 = vmatpush.msra.mxu0 %v96_v0  ;;  %134 = vmatpush.msra.mxu1 %v96_v0  ;;  %v94_v2 = vld [vmem:[#allocation2 + $0x28] sm:$0xff]  ;;  %v93_v3 = vld [vmem:[#allocation2 + $0x20] sm:$0xff]  ;;  %v92_v4 = vld [vmem:[#allocation2 + $0x18] sm:$0xff]  ;;  %vm163_vm5 = vcmask 64512  }
  0x10   :  { %v91_v5 = vld [vmem:[#allocation2 + $0x10] sm:$0xff]  ;;  %v97_v6 = vld [vmem:[%s801_s1] sm:$0xff]  ;;  %v90_v7 = vld [vmem:[#allocation2 + $0x8] sm:$0xff] }
  0x11   :  { %112 = vmatpush.msra.mxu0 %v95_v1  ;;  %135 = vmatpush.msra.mxu1 %v95_v1  ;;  %v89_v8 = vld [vmem:[#allocation2] sm:$0xff]  ;;  %v98_v9 = vmul.f32 %v97_v6, %v97_v6  ;;  %v571_v14 = vld [vmem:[%s804_s4 + $0x18] sm:$0xff]  ;;  %v570_v16 = vld [vmem:[%s804_s4 + $0x10] sm:$0xff] }
  0x12   :  { %224 = vmatpush.bf16.msra.mxu3 %v571_v14  ;;  %v569_v18 = vld [vmem:[%s804_s4 + $0x8] sm:$0xff]  ;;  %v71_v28 = vld [vmem:[%s800_s0] sm:$0xff]  ;;  %v745_v33 = vld [vmem:[#allocation4 + $0x38] sm:$0xff] }
  0x13   :  { %113 = vmatpush.msra.mxu0 %v94_v2  ;;  %136 = vmatpush.msra.mxu1 %v94_v2  ;;  %v738_v31 = vpack.c.bf16 %v71_v28, %v71_v28  ;;  %v568_v32 = vld [vmem:[%s804_s4] sm:$0xff]  ;;  %v749_v34 = vld [vmem:[#allocation4 + $0x30] sm:$0xff]  ;;  %v753_v35 = vld [vmem:[#allocation4 + $0x28] sm:$0xff] }
  0x14   :  { %284 = vmatpush.bf16.msra.mxu2 %v745_v33  ;;  %v757_v36 = vld [vmem:[#allocation4 + $0x20] sm:$0xff]  ;;  %v761_v37 = vld [vmem:[#allocation4 + $0x18] sm:$0xff]  ;;  %v765_v38 = vld [vmem:[#allocation4 + $0x10] sm:$0xff] }
  0x15   :  { %114 = vmatpush.msra.mxu0 %v93_v3  ;;  %137 = vmatpush.msra.mxu1 %v93_v3  ;;  %v769_v39 = vld [vmem:[#allocation4 + $0x8] sm:$0xff]  ;;  %v774_v43 = vld [vmem:[#allocation4] sm:$0xff]  ;;  %v579_v55 = vld [vmem:[#allocation6 + $0x38] sm:$0xff] }
  0x16   :  { %225 = vmatpush.bf16.msra.mxu3 %v570_v16  ;;  %v578_v57 = vld [vmem:[#allocation6 + $0x30] sm:$0xff]  ;;  %v577_v59 = vld [vmem:[#allocation6 + $0x28] sm:$0xff]  ;;  %v576_v61 = vld [vmem:[#allocation6 + $0x20] sm:$0xff] }
  0x17   :  { %115 = vmatpush.msra.mxu0 %v92_v4  ;;  %138 = vmatpush.msra.mxu1 %v92_v4  ;;  %v575_v0 = vld [vmem:[#allocation6 + $0x18] sm:$0xff]  ;;  %v574_v3 = vld [vmem:[#allocation6 + $0x10] sm:$0xff] }
  0x18   :  { %285 = vmatpush.bf16.msra.mxu2 %v749_v34 }
  0x19   :  { %116 = vmatpush.msra.mxu0 %v91_v5  ;;  %139 = vmatpush.msra.mxu1 %v91_v5 }
  0x1a   :  { %226 = vmatpush.bf16.msra.mxu3 %v569_v18 }
  0x1b   :  { %117 = vmatpush.msra.mxu0 %v90_v7  ;;  %140 = vmatpush.msra.mxu1 %v90_v7 }
  0x1c   :  { %286 = vmatpush.bf16.msra.mxu2 %v753_v35 }
  0x1d   :  { %118 = vmatpush.msra.mxu0 %v89_v8  ;;  %141 = vmatpush.msra.mxu1 %v89_v8  ;;  %v573_v8 = vld [vmem:[#allocation6 + $0x8] sm:$0xff] }
  0x1e   :  { %475 = vmatmul.msk.f32.vlgmr.msra.gmra.mxu0 %vm99_vm0, %v97_v6  ;;  %476 = vmatmul.msk.f32.vlgmr.msra.gmra.mxu1 %vm99_vm0, %v98_v9 }
  0x1f   :  { %227 = vmatpush.bf16.msra.mxu3 %v568_v32 }
  0x20   :  { %287 = vmatpush.bf16.msra.mxu2 %v757_v36 }
  0x23   :  { %409 = vmatpush.bf16.msrb.mxu3 %v579_v55 }
  0x24   :  { %288 = vmatpush.bf16.msra.mxu2 %v761_v37 }
  0x27   :  { %410 = vmatpush.bf16.msrb.mxu3 %v578_v57 }
  0x28   :  { %289 = vmatpush.bf16.msra.mxu2 %v765_v38 }
  0x2b   :  { %411 = vmatpush.bf16.msrb.mxu3 %v577_v59 }
  0x2c   :  { %290 = vmatpush.bf16.msra.mxu2 %v769_v39 }
  0x2f   :  { %412 = vmatpush.bf16.msrb.mxu3 %v576_v61 }
  0x30   :  { %291 = vmatpush.bf16.msra.mxu2 %v774_v43 }
  0x33   :  { %413 = vmatpush.bf16.msrb.mxu3 %v575_v0 }
  0x34   :  { %438 = vmatpush.bf16.msrb.mxu2 %v745_v33 }
  0x37   :  { %414 = vmatpush.bf16.msrb.mxu3 %v574_v3 }
  0x38   :  { %439 = vmatpush.bf16.msrb.mxu2 %v749_v34 }
  0x3b   :  { %415 = vmatpush.bf16.msrb.mxu3 %v573_v8 }
  0x3c   :  { %440 = vmatpush.bf16.msrb.mxu2 %v753_v35 }
  0x40   :  { %441 = vmatpush.bf16.msrb.mxu2 %v757_v36 }
  0x44   :  { %442 = vmatpush.bf16.msrb.mxu2 %v761_v37 }
  0x48   :  { %443 = vmatpush.bf16.msrb.mxu2 %v765_v38 }
  0x4c   :  { %444 = vmatpush.bf16.msrb.mxu2 %v769_v39 }
  0x50   :  { %445 = vmatpush.bf16.msrb.mxu2 %v774_v43 }
  0x9b   :  { %v120_v10 = vpop.f32.mrf.mxu0  ;;  %v143_v11 = vpop.f32.mrf.mxu1 }
  0x9c   :  { %v146_v12 = vmul.f32 %v120_v10, %v120_v10  ;;  %v149_v25 = vsub.f32 %v97_v6, %v120_v10 }
  0x9e   :  { %v147_v13 = vsub.f32 %v143_v11, %v146_v12  ;;  %v572_v12 = vld [vmem:[#allocation6] sm:$0xff] }
  0x9f   :  { %416 = vmatpush.bf16.msrb.mxu3 %v572_v12 }
  0xa0   :  { %v148_v15 = vmax.f32 %v147_v13, 0.0 }
  0xa2   :  { %v150_v17 = vadd.f32 1e-05, %v148_v15 }
  0xa4   :  { %587 = vrsqrt.f32 %v150_v17  ;;  %vm157_vm2 = vweird.f32 %v150_v17 }
  0xaa   :  { %v588_v19 = vpop.eup %587 }
  0xab   :  { %v152_v20 = vmul.f32 %v588_v19, %v150_v17  ;;  %vm158_vm1 = vweird.f32 %v588_v19 }
  0xac   :  { %vm159_vm3 = vmor %vm157_vm2, %vm158_vm1 }
  0xad   :  { %v153_v21 = vmul.f32 %v588_v19, %v152_v20 }
  0xaf   :  { %v154_v22 = vmul.f32 0.5, %v153_v21 }
  0xb1   :  { %v155_v23 = vsub.f32 1.5, %v154_v22 }
  0xb3   :  { %v156_v24 = vmul.f32 %v588_v19, %v155_v23 }
  0xb5   :  { %v160_v26 = vsel %vm159_vm3, %v588_v19, %v156_v24 }
  0xb6   :  { %v161_v27 = vmul.f32 %v160_v26, %v149_v25 }
  0xb8   :  { %v162_v29 = vpack.c.bf16 %v161_v27, %v161_v27 }
  0xba   :  { %v169_v30 = vsel %vm167_vm4, %v162_v29, 0 }
  0xbb   :  { %178 = vmatpush.bf16.msrb.mxu0 %v169_v30 }
  0xbe   :  { %477 = vmatmul.msk.bf16.vlgmr.msrb.gmra.mxu0 %vm163_vm5, %v738_v31 }
  0xbf   :  { %297 = vmatpush.bf16.msra.mxu0 %v745_v33 }
  0xc3   :  { %298 = vmatpush.bf16.msra.mxu0 %v749_v34 }
  0xc7   :  { %299 = vmatpush.bf16.msra.mxu0 %v753_v35 }
  0xcb   :  { %300 = vmatpush.bf16.msra.mxu0 %v757_v36 }
  0xcf   :  { %301 = vmatpush.bf16.msra.mxu0 %v761_v37 }
  0xd3   :  { %302 = vmatpush.bf16.msra.mxu0 %v765_v38 }
  0xd7   :  { %303 = vmatpush.bf16.msra.mxu0 %v769_v39 }
  0xdb   :  { %304 = vmatpush.bf16.msra.mxu0 %v774_v43 }
 0x13b   :  { %v180_v40 = vpop.f32.mrf.mxu0 }
 0x13c   :  { %v184_v41 = vpack.c.bf16 %v180_v40, %v180_v40 }
 0x13e   :  { %494 = vmatmul.msk.bf16.vlgmr.msra.gmra.mxu3 %vm99_vm0, %v184_v41 }
 0x143   :  { %v182_v42 = vpop.f32.mrf.mxu0 }
 0x1c1   :  { %v229_v44 = vpop.f32.mrf.mxu3 }
 0x1c2   :  { %v234_v45 = vmul.f32 %v229_v44, %v229_v44  ;;  %v233_v46 = vpack.c.bf16 %v229_v44, %v229_v44 }
 0x1c4   :  { %v235_v47 = vpack.c.bf16 %v234_v45, %v234_v45  ;;  %292 = vmatmul.bf16.vlgmr.msra.gmra.mxu2 %v233_v46 }
 0x1c6   :  { %305 = vmatmul.bf16.vlgmr.msra.gmra.mxu0 %v235_v47 }
 0x1c9   :  { %v231_v48 = vpop.f32.mrf.mxu3 }
 0x243   :  { %v306_v49 = vpop.f32.mrf.mxu0 }
 0x247   :  { %v293_v50 = vpop.f32.mrf.mxu2 }
 0x248   :  { %v310_v51 = vmul.f32 %v293_v50, %v293_v50  ;;  %v313_v5 = vsub.f32 %v229_v44, %v293_v50 }
 0x24a   :  { %v311_v52 = vsub.f32 %v306_v49, %v310_v51 }
 0x24b   :  { %v308_v53 = vpop.f32.mrf.mxu0 }
 0x24c   :  { %v312_v54 = vmax.f32 %v311_v52, 0.0 }
 0x24e   :  { %v314_v56 = vadd.f32 1e-05, %v312_v54 }
 0x24f   :  { %v295_v58 = vpop.f32.mrf.mxu2 }
 0x250   :  { %589 = vrsqrt.f32 %v314_v56  ;;  %vm321_vm7 = vweird.f32 %v314_v56 }
 0x256   :  { %v590_v60 = vpop.eup %589 }
 0x257   :  { %v316_v62 = vmul.f32 %v590_v60, %v314_v56  ;;  %vm322_vm6 = vweird.f32 %v590_v60 }
 0x258   :  { %vm323_vm8 = vmor %vm321_vm7, %vm322_vm6 }
 0x259   :  { %v317_v63 = vmul.f32 %v590_v60, %v316_v62 }
 0x25b   :  { %v318_v1 = vmul.f32 0.5, %v317_v63 }
 0x25d   :  { %v319_v2 = vsub.f32 1.5, %v318_v1 }
 0x25f   :  { %v320_v4 = vmul.f32 %v590_v60, %v319_v2 }
 0x261   :  { %v324_v6 = vsel %vm323_vm8, %v590_v60, %v320_v4 }
 0x262   :  { %v325_v7 = vmul.f32 %v324_v6, %v313_v5 }
 0x264   :  { %v326_v9 = vmax.f32 %v325_v7, 0.0 }
 0x266   :  { %v327_v10 = vpack.c.bf16 %v326_v9, %v326_v9 }
 0x268   :  { %v329_v11 = vsel %vm167_vm4, %v327_v10, 0 }
 0x269   :  { %338 = vmatpush.bf16.msrb.mxu1 %v329_v11 }
 0x26c   :  { %527 = vmatmul.msk.bf16.vlgmr.msrb.gmra.mxu1 %vm163_vm5, %v738_v31 }
 0x26d   :  { %425 = vmatpush.bf16.msra.mxu1 %v745_v33 }
 0x271   :  { %426 = vmatpush.bf16.msra.mxu1 %v749_v34 }
 0x275   :  { %427 = vmatpush.bf16.msra.mxu1 %v753_v35 }
 0x279   :  { %428 = vmatpush.bf16.msra.mxu1 %v757_v36 }
 0x27d   :  { %429 = vmatpush.bf16.msra.mxu1 %v761_v37 }
 0x281   :  { %430 = vmatpush.bf16.msra.mxu1 %v765_v38 }
 0x285   :  { %431 = vmatpush.bf16.msra.mxu1 %v769_v39 }
 0x289   :  { %432 = vmatpush.bf16.msra.mxu1 %v774_v43 }
 0x2e9   :  { %v340_v13 = vpop.f32.mrf.mxu1 }
 0x2ea   :  { %v344_v14 = vpack.c.bf16 %v340_v13, %v340_v13 }
 0x2ec   :  { %417 = vmatmul.bf16.vlgmr.msrb.gmra.mxu3 %v344_v14 }
 0x2f1   :  { %v342_v15 = vpop.f32.mrf.mxu1 }
 0x36f   :  { %v418_v16 = vpop.f32.mrf.mxu3 }
 0x370   :  { %v422_v17 = vpack.c.bf16 %v418_v16, %v418_v16  ;;  %v423_v18 = vmul.f32 %v418_v16, %v418_v16 }
 0x372   :  { %433 = vmatmul.bf16.vlgmr.msra.gmra.mxu1 %v422_v17  ;;  %v424_v19 = vpack.c.bf16 %v423_v18, %v423_v18 }
 0x374   :  { %446 = vmatmul.bf16.vlgmr.msrb.gmra.mxu2 %v424_v19 }
 0x377   :  { %v420_v20 = vpop.f32.mrf.mxu3 }
 0x3ef   :  { %v434_v21 = vpop.f32.mrf.mxu1 }
 0x3f0   :  { %v451_v22 = vmul.f32 %v434_v21, %v434_v21  ;;  %v454_v35 = vsub.f32 %v418_v16, %v434_v21 }
 0x3f7   :  { %v436_v23 = vpop.f32.mrf.mxu1  ;;  %v447_v24 = vpop.f32.mrf.mxu2 }
 0x3f8   :  { %v452_v25 = vsub.f32 %v447_v24, %v451_v22 }
 0x3fa   :  { %v453_v26 = vmax.f32 %v452_v25, 0.0 }
 0x3fc   :  { %v455_v27 = vadd.f32 1e-05, %v453_v26 }
 0x3fe   :  { %591 = vrsqrt.f32 %v455_v27  ;;  %vm462_vm10 = vweird.f32 %v455_v27 }
 0x3ff   :  { %v449_v28 = vpop.f32.mrf.mxu2 }
 0x404   :  { %v592_v29 = vpop.eup %591 }
 0x405   :  { %v457_v30 = vmul.f32 %v592_v29, %v455_v27  ;;  %vm463_vm9 = vweird.f32 %v592_v29 }
 0x406   :  { %vm464_vm11 = vmor %vm462_vm10, %vm463_vm9 }
 0x407   :  { %v458_v31 = vmul.f32 %v592_v29, %v457_v30 }
 0x409   :  { %v459_v32 = vmul.f32 0.5, %v458_v31 }
 0x40b   :  { %v460_v33 = vsub.f32 1.5, %v459_v32 }
 0x40d   :  { %v461_v34 = vmul.f32 %v592_v29, %v460_v33 }
 0x40f   :  { %v465_v36 = vsel %vm464_vm11, %v592_v29, %v461_v34 }
 0x410   :  { %v466_v37 = vmul.f32 %v465_v36, %v454_v35 }
 0x412   :  { %v467_v38 = vmax.f32 %v466_v37, 0.0 }
 0x414   :  { %468 = vst [vmem:[%s806_s6] sm:$0xff] %v467_v38 }
 0x415   :  { %473 = vsyncpa [#allocation3], 1 }
 0x416   :  { %474 = vsyncpa [#allocation5], 1 }

</bundles_post_ra>
